<compile_context>
chip_gen: v7x
topology: tpu7x:2x2x1
jax: 0.10.0
libtpu: 0.0.40
codegen_flags: <defaults>
</compile_context>

<pallas_src>
import jax
import jax.numpy as jnp
import numpy as np
from jax.experimental import pallas as pl
from jax.experimental.pallas import tpu as pltpu


def mhgat_kernel(bias_ref, s_ref, t_ref, wh_ref, g_ref, w0_ref, out_ref, gated_ref):
    H, _, D = wh_ref.shape

    # Cast the additive adjacency mask to f32 once per row tile; reused by all heads.
    bias = bias_ref[...].astype(jnp.float32)                  # (TM, N)
    s_full = s_ref[...]                                       # (TM, H) query-side scores
    g_full = g_ref[...]                                       # (TM, H) per-head gates

    # Static unroll over heads: every slice offset below is a compile-time constant.
    for hd in range(H):
        e = s_full[:, hd:hd + 1] + t_ref[hd:hd + 1, :]        # (TM,1)+(1,N) -> (TM,N)
        e = jnp.maximum(e, 0.01 * e)                          # leaky_relu (slope 0.01)
        e = e + bias                                          # mask: 0 / -1e30

        m = jnp.max(e, axis=1, keepdims=True)                 # (TM, 1)
        # TODO(synk): on v6e/v7x a bf16 exp (bf16 EUP) or block-sparse column skipping
        # would relieve the EUP-bound regime for small D; kept f32 for v5e / accuracy.
        p = jnp.exp(e - m)                                    # masked cols underflow to 0
        rowsum = jnp.sum(p, axis=1, keepdims=True)            # (TM, 1), always >= 1

        # Unnormalized neighbor aggregation on the MXU (bf16 operands, f32 accumulate);
        # normalization deferred to an EUP approximate reciprocal of the row sums.
        unnorm = jnp.dot(p.astype(jnp.bfloat16), wh_ref[hd],
                         preferred_element_type=jnp.float32)  # (TM, D)
        inv = pl.reciprocal(rowsum, approx=True)
        new_h = jnp.maximum(unnorm * inv, 0.0)                # relu
        gated = g_full[:, hd:hd + 1] * new_h                  # per-head gate

        gated_ref[:, hd * D:(hd + 1) * D] = gated.astype(jnp.bfloat16)

    # One wide output projection (K = H*D) on the MXU, written exactly once per tile.
    out_ref[...] = jnp.dot(gated_ref[...], w0_ref[...],
                           preferred_element_type=jnp.float32)


def _pad(x, m):
    return ((x + m - 1) // m) * m


def _tile_bytes(rows, cols, itemsize):
    # VMEM layout pads the lane (last) dim to 128 and the sublane dim to 8.
    return _pad(rows, 8) * _pad(cols, 128) * itemsize


def multihead_gaatn(h, adj, g, W_heads, Wk_heads, W0, *, row_tile=256):
    """h: (N,D), adj: (N,N) 0/1, g: (N,H), W_heads: (H,D,D), Wk_heads: (H,2D), W0: (D,H*D).

    row_tile: upper bound on the rows processed per grid step.  Good starting points:
    128-256 on v7x (64 MiB VMEM per TC), 512 on v5e/v6e (128 MiB).  The wrapper
    shrinks it automatically until the working set fits ~85% of physical VMEM and at
    least two row tiles exist (so v7x megacore engages).
    """
    N, D = h.shape
    H = W_heads.shape[0]

    hf = h.astype(jnp.float32)
    Wf = W_heads.astype(jnp.float32)
    wk_a = Wk_heads[:, :D].astype(jnp.float32)               # (H, D) query-side key
    wk_b = Wk_heads[:, D:].astype(jnp.float32)               # (H, D) neighbor-side key

    # Per-head projections produced directly in (H, N, D) layout (one batched matmul,
    # no extra transpose/relayout pass over the largest intermediate).
    wh_f32 = jnp.einsum('nd,hed->hne', hf, Wf)               # wh^hd = h @ W_hd^T
    s_all = jnp.einsum('hnd,hd->nh', wh_f32, wk_a)           # (N, H) query-side scores
    t_all = jnp.einsum('hnd,hd->hn', wh_f32, wk_b)           # (H, N) neighbor-side scores
    wh_all = wh_f32.astype(jnp.bfloat16)                     # (H, N, D) MXU operand

    g_all = g.astype(jnp.float32)                            # (N, H)
    w0t = jnp.transpose(W0).astype(jnp.bfloat16)             # (H*D, D) for one K=H*D matmul

    # Additive adjacency bias: 0 for neighbors, -1e30 otherwise (bf16 halves VMEM/DMA).
    bias = jnp.where(adj > 0.5, 0.0, -1e30).astype(jnp.bfloat16)   # (N, N)

    # ---- tile-size / VMEM policy (clamped to physical VMEM, real working set) -----
    def working_set(tm_):
        return (2 * _tile_bytes(tm_, N, 2)            # bias tile, double-buffered
                + 2 * H * _tile_bytes(N, D, 2)        # resident per-head value matrices
                + 2 * _tile_bytes(H, N, 4)            # neighbor-side scores (resident)
                + 4 * _tile_bytes(tm_, H, 4)          # s + g tiles, double-buffered
                + 2 * _tile_bytes(H * D, D, 2)        # W0^T (resident)
                + 2 * _tile_bytes(tm_, D, 4)          # output tile
                + _tile_bytes(tm_, H * D, 2)          # gated scratch
                + 3 * _tile_bytes(tm_, N, 4))         # live f32 temporaries (bias, e, p)

    try:
        cap = int(getattr(pltpu.get_tpu_info(), "vmem_capacity_bytes", 0)) or (64 << 20)
    except Exception:  # conservative default = v7x per-TC VMEM
        cap = 64 << 20
    budget = int(0.85 * cap)

    tm = min(row_tile, N)
    assert N % tm == 0, "row_tile must divide N"
    while working_set(tm) > budget and tm >= 32 and tm % 2 == 0:
        tm //= 2                                      # shrink until the working set fits
    if N // tm < 2 and tm >= 32 and tm % 2 == 0:
        tm //= 2                                      # keep >= 2 row tiles for megacore
    assert tm % 8 == 0 or tm == N, "row tile must be sublane-aligned"
    vmem_limit = int(min(budget, max(working_set(tm), 16 << 20)))

    grid_spec = pltpu.PrefetchScalarGridSpec(
        num_scalar_prefetch=0,
        grid=(N // tm,),
        in_specs=[
            pl.BlockSpec((tm, N), lambda i: (i, 0)),        # additive adjacency bias
            pl.BlockSpec((tm, H), lambda i: (i, 0)),        # query-side key scores
            pl.BlockSpec((H, N), lambda i: (0, 0)),         # neighbor-side key scores (resident)
            pl.BlockSpec((H, N, D), lambda i: (0, 0, 0)),   # per-head value matrices (resident)
            pl.BlockSpec((tm, H), lambda i: (i, 0)),        # per-head gates
            pl.BlockSpec((H * D, D), lambda i: (0, 0)),     # full W0^T (resident)
        ],
        out_specs=pl.BlockSpec((tm, D), lambda i: (i, 0)),
        scratch_shapes=[pltpu.VMEM((tm, H * D), jnp.bfloat16)],
    )

    return pl.pallas_call(
        mhgat_kernel,
        out_shape=jax.ShapeDtypeStruct((N, D), jnp.float32),
        grid_spec=grid_spec,
        compiler_params=pltpu.CompilerParams(
            dimension_semantics=("parallel",),
            vmem_limit_bytes=vmem_limit),
    )(bias, s_all, t_all, wh_all, g_all, w0t)


# TODO(synk): GetGate is not defined in the reference source; assumed here to be
# Linear(input_dim -> n_heads, bias=False) followed by a sigmoid gate.
def get_gate(h, Wg):
    return jax.nn.sigmoid(h @ Wg.T)


def ragged_reference(h, adj, g, W_heads, Wk_heads, W0):
    """NumPy port of the original ragged PyTorch forward, for validation."""
    h = np.asarray(h, dtype=np.float64)
    adj = np.asarray(adj)
    g = np.asarray(g, dtype=np.float64)
    W_heads = np.asarray(W_heads, dtype=np.float64)
    Wk_heads = np.asarray(Wk_heads, dtype=np.float64)
    W0 = np.asarray(W0, dtype=np.float64)
    N, D = h.shape
    H = W_heads.shape[0]
    head_outs = []
    for hd in range(H):
        W = W_heads[hd]
        wk = Wk_heads[hd]                     # (2D,)
        wh = h @ W.T
        new_h = np.zeros((N, D), dtype=np.float64)
        for i in range(N):
            nbrs = np.where(adj[i] > 0.5)[0]
            whjs = h[nbrs] @ W.T
            temp = np.tile(wh[i], (len(nbrs), 1))
            qk = np.concatenate([temp, whjs], axis=1)
            wqk = qk @ wk
            e = np.where(wqk > 0, wqk, 0.01 * wqk)
            e = e - e.max()
            a = np.exp(e) / np.exp(e).sum()
            new_h[i] = (a[:, None] * whjs).sum(0)
        new_h = np.maximum(new_h, 0.0)
        head_outs.append(g[:, hd:hd + 1] * new_h)
    heads = np.concatenate(head_outs, axis=1)
    return heads @ W0.T


if __name__ == "__main__":
    N, D, H = 32, 32, 4          # num nodes, input_dim, n_heads

    key = jax.random.PRNGKey(0)
    k_h, k_adj, k_w, k_wk, k_w0, k_wg = jax.random.split(key, 6)

    h = jax.random.normal(k_h, (N, D), dtype=jnp.float32)

    # adjacency: random 0/1, with self-loop guaranteed so every node has >= 1 neighbor
    adj_rand = (jax.random.uniform(k_adj, (N, N)) > 0.5).astype(jnp.float32)
    adj = jnp.maximum(adj_rand, jnp.eye(N, dtype=jnp.float32))

    # deterministic parameter init (synthetic, matching the PyTorch module shapes)
    W_heads = 0.1 * jax.random.normal(k_w, (H, D, D), dtype=jnp.float32)     # fciandj per head
    Wk_heads = 0.1 * jax.random.normal(k_wk, (H, 2 * D), dtype=jnp.float32)  # key per head
    W0 = 0.1 * jax.random.normal(k_w0, (D, H * D), dtype=jnp.float32)        # w0.weight
    Wg = 0.1 * jax.random.normal(k_wg, (H, D), dtype=jnp.float32)            # assumed GetGate weight

    g = get_gate(h, Wg)                                                      # (N, H)

    # Default row_tile; the policy shrinks it to 16 here (2 row tiles x in-kernel head loop).
    out = multihead_gaatn(h, adj, g, W_heads, Wk_heads, W0)
    out = jax.block_until_ready(out)

    ref = ragged_reference(h, adj, g, W_heads, Wk_heads, W0)
    # Tolerance reflects bf16 MXU operands + approximate EUP reciprocal (f32 accumulation);
    # a semantic error would be off by O(0.1+), far outside these bounds.
    np.testing.assert_allclose(np.asarray(out), ref, rtol=2e-2, atol=1e-2)

    print("KERNEL_OK")
</pallas_src>

<mosaic_0001>
module attributes {stable_mosaic.version = 11 : i64} {
  func.func @mhgat_kernel(%arg0: i32, %arg1: memref<16x32xbf16, #tpu.memory_space<vmem>>, %arg2: memref<16x4xf32, #tpu.memory_space<vmem>>, %arg3: memref<4x32xf32, #tpu.memory_space<vmem>>, %arg4: memref<4x32x32xbf16, #tpu.memory_space<vmem>>, %arg5: memref<16x4xf32, #tpu.memory_space<vmem>>, %arg6: memref<128x32xbf16, #tpu.memory_space<vmem>>, %arg7: memref<16x32xf32, #tpu.memory_space<vmem>>, %arg8: memref<16x128xbf16, #tpu.memory_space<vmem>>) attributes {dimension_semantics = [#tpu.dimension_semantics<parallel>], iteration_bounds = array<i64: 2>, scalar_prefetch = 0 : i64, scratch_operands = 1 : i64, tpu.core_type = #tpu.core_type<tc>, window_params = [{transform_indices = @transform_0, window_bounds = array<i64: 16, 32>}, {transform_indices = @transform_1, window_bounds = array<i64: 16, 4>}, {pipeline_mode = #tpu.pipeline_mode<synchronous>, transform_indices = @transform_2, window_bounds = array<i64: 4, 32>}, {pipeline_mode = #tpu.pipeline_mode<synchronous>, transform_indices = @transform_3, window_bounds = array<i64: 4, 32, 32>}, {transform_indices = @transform_4, window_bounds = array<i64: 16, 4>}, {pipeline_mode = #tpu.pipeline_mode<synchronous>, transform_indices = @transform_5, window_bounds = array<i64: 128, 32>}, {transform_indices = @transform_6, window_bounds = array<i64: 16, 32>}]} {
    %c0 = arith.constant 0 : index
    %c0_0 = arith.constant 0 : index
    %0 = vector.load %arg1[%c0, %c0_0] : memref<16x32xbf16, #tpu.memory_space<vmem>>, vector<16x32xbf16>
    %1 = arith.extf %0 : vector<16x32xbf16> to vector<16x32xf32>
    %c0_1 = arith.constant 0 : index
    %c0_2 = arith.constant 0 : index
    %2 = vector.load %arg2[%c0_1, %c0_2] : memref<16x4xf32, #tpu.memory_space<vmem>>, vector<16x4xf32>
    %c0_3 = arith.constant 0 : index
    %c0_4 = arith.constant 0 : index
    %3 = vector.load %arg5[%c0_3, %c0_4] : memref<16x4xf32, #tpu.memory_space<vmem>>, vector<16x4xf32>
    %4 = vector.extract_strided_slice %2 {offsets = [0, 0], sizes = [16, 1], strides = [1, 1]} : vector<16x4xf32> to vector<16x1xf32>
    %c0_5 = arith.constant 0 : index
    %c0_6 = arith.constant 0 : index
    %5 = vector.load %arg3[%c0_5, %c0_6] : memref<4x32xf32, #tpu.memory_space<vmem>>, vector<1x32xf32>
    %6 = vector.broadcast %4 : vector<16x1xf32> to vector<16x32xf32>
    %7 = vector.broadcast %5 : vector<1x32xf32> to vector<16x32xf32>
    %8 = arith.addf %6, %7 : vector<16x32xf32>
    %cst = arith.constant 0.00999999977 : f32
    %9 = vector.broadcast %cst : f32 to vector<16x32xf32>
    %10 = arith.mulf %9, %8 : vector<16x32xf32>
    %11 = arith.maximumf %8, %10 : vector<16x32xf32>
    %12 = arith.addf %11, %1 : vector<16x32xf32>
    %cst_7 = arith.constant dense<0xFF800000> : vector<16xf32>
    %13 = vector.multi_reduction <maximumf>, %12, %cst_7 [1] : vector<16x32xf32> to vector<16xf32>
    %14 = vector.shape_cast %13 : vector<16xf32> to vector<16x1xf32>
    %15 = vector.broadcast %14 : vector<16x1xf32> to vector<16x32xf32>
    %16 = arith.subf %12, %15 : vector<16x32xf32>
    %17 = math.exp %16 : vector<16x32xf32>
    %cst_8 = arith.constant dense<0.000000e+00> : vector<16xf32>
    %18 = vector.multi_reduction <add>, %17, %cst_8 [1] : vector<16x32xf32> to vector<16xf32>
    %19 = vector.shape_cast %18 : vector<16xf32> to vector<16x1xf32>
    %20 = arith.truncf %17 : vector<16x32xf32> to vector<16x32xbf16>
    %c0_9 = arith.constant 0 : index
    %c0_10 = arith.constant 0 : index
    %c0_11 = arith.constant 0 : index
    %21 = vector.load %arg4[%c0_9, %c0_10, %c0_11] : memref<4x32x32xbf16, #tpu.memory_space<vmem>>, vector<1x32x32xbf16>
    %22 = vector.shape_cast %21 : vector<1x32x32xbf16> to vector<32x32xbf16>
    %cst_12 = arith.constant dense<0.000000e+00> : vector<16x32xf32>
    %23 = tpu.matmul %20, %22, %cst_12 {dimension_numbers = #tpu.dot_dimension_numbers<[1], [0], [0], [1], [0, 0, 1, 1], [], []>} : vector<16x32xbf16>, vector<32x32xbf16>, vector<16x32xf32> -> vector<16x32xf32>
    %24 = tpu.reciprocal %19 {approx = true} : vector<16x1xf32> -> vector<16x1xf32>
    %25 = vector.broadcast %24 : vector<16x1xf32> to vector<16x32xf32>
    %26 = arith.mulf %23, %25 : vector<16x32xf32>
    %cst_13 = arith.constant 0.000000e+00 : f32
    %27 = vector.broadcast %cst_13 : f32 to vector<16x32xf32>
    %28 = arith.maximumf %26, %27 : vector<16x32xf32>
    %29 = vector.extract_strided_slice %3 {offsets = [0, 0], sizes = [16, 1], strides = [1, 1]} : vector<16x4xf32> to vector<16x1xf32>
    %30 = vector.broadcast %29 : vector<16x1xf32> to vector<16x32xf32>
    %31 = arith.mulf %30, %28 : vector<16x32xf32>
    %32 = arith.truncf %31 : vector<16x32xf32> to vector<16x32xbf16>
    %c0_14 = arith.constant 0 : index
    %c0_15 = arith.constant 0 : index
    %33 = vector.load %arg8[%c0_14, %c0_15] : memref<16x128xbf16, #tpu.memory_space<vmem>>, vector<16x32xbf16>
    tpu.vector_store %arg8[%c0_14, %c0_15], %32 {strides = array<i32>} : memref<16x128xbf16, #tpu.memory_space<vmem>>, vector<16x32xbf16>,
    %34 = vector.extract_strided_slice %2 {offsets = [0, 1], sizes = [16, 1], strides = [1, 1]} : vector<16x4xf32> to vector<16x1xf32>
    %c1 = arith.constant 1 : index
    %c0_16 = arith.constant 0 : index
    %35 = vector.load %arg3[%c1, %c0_16] : memref<4x32xf32, #tpu.memory_space<vmem>>, vector<1x32xf32>
    %36 = vector.broadcast %34 : vector<16x1xf32> to vector<16x32xf32>
    %37 = vector.broadcast %35 : vector<1x32xf32> to vector<16x32xf32>
    %38 = arith.addf %36, %37 : vector<16x32xf32>
    %cst_17 = arith.constant 0.00999999977 : f32
    %39 = vector.broadcast %cst_17 : f32 to vector<16x32xf32>
    %40 = arith.mulf %39, %38 : vector<16x32xf32>
    %41 = arith.maximumf %38, %40 : vector<16x32xf32>
    %42 = arith.addf %41, %1 : vector<16x32xf32>
    %cst_18 = arith.constant dense<0xFF800000> : vector<16xf32>
    %43 = vector.multi_reduction <maximumf>, %42, %cst_18 [1] : vector<16x32xf32> to vector<16xf32>
    %44 = vector.shape_cast %43 : vector<16xf32> to vector<16x1xf32>
    %45 = vector.broadcast %44 : vector<16x1xf32> to vector<16x32xf32>
    %46 = arith.subf %42, %45 : vector<16x32xf32>
    %47 = math.exp %46 : vector<16x32xf32>
    %cst_19 = arith.constant dense<0.000000e+00> : vector<16xf32>
    %48 = vector.multi_reduction <add>, %47, %cst_19 [1] : vector<16x32xf32> to vector<16xf32>
    %49 = vector.shape_cast %48 : vector<16xf32> to vector<16x1xf32>
    %50 = arith.truncf %47 : vector<16x32xf32> to vector<16x32xbf16>
    %c1_20 = arith.constant 1 : index
    %c0_21 = arith.constant 0 : index
    %c0_22 = arith.constant 0 : index
    %51 = vector.load %arg4[%c1_20, %c0_21, %c0_22] : memref<4x32x32xbf16, #tpu.memory_space<vmem>>, vector<1x32x32xbf16>
    %52 = vector.shape_cast %51 : vector<1x32x32xbf16> to vector<32x32xbf16>
    %cst_23 = arith.constant dense<0.000000e+00> : vector<16x32xf32>
    %53 = tpu.matmul %50, %52, %cst_23 {dimension_numbers = #tpu.dot_dimension_numbers<[1], [0], [0], [1], [0, 0, 1, 1], [], []>} : vector<16x32xbf16>, vector<32x32xbf16>, vector<16x32xf32> -> vector<16x32xf32>
    %54 = tpu.reciprocal %49 {approx = true} : vector<16x1xf32> -> vector<16x1xf32>
    %55 = vector.broadcast %54 : vector<16x1xf32> to vector<16x32xf32>
    %56 = arith.mulf %53, %55 : vector<16x32xf32>
    %cst_24 = arith.constant 0.000000e+00 : f32
    %57 = vector.broadcast %cst_24 : f32 to vector<16x32xf32>
    %58 = arith.maximumf %56, %57 : vector<16x32xf32>
    %59 = vector.extract_strided_slice %3 {offsets = [0, 1], sizes = [16, 1], strides = [1, 1]} : vector<16x4xf32> to vector<16x1xf32>
    %60 = vector.broadcast %59 : vector<16x1xf32> to vector<16x32xf32>
    %61 = arith.mulf %60, %58 : vector<16x32xf32>
    %62 = arith.truncf %61 : vector<16x32xf32> to vector<16x32xbf16>
    %c0_25 = arith.constant 0 : index
    %c32 = arith.constant 32 : index
    %63 = vector.load %arg8[%c0_25, %c32] : memref<16x128xbf16, #tpu.memory_space<vmem>>, vector<16x32xbf16>
    tpu.vector_store %arg8[%c0_25, %c32], %62 {strides = array<i32>} : memref<16x128xbf16, #tpu.memory_space<vmem>>, vector<16x32xbf16>,
    %64 = vector.extract_strided_slice %2 {offsets = [0, 2], sizes = [16, 1], strides = [1, 1]} : vector<16x4xf32> to vector<16x1xf32>
    %c2 = arith.constant 2 : index
    %c0_26 = arith.constant 0 : index
    %65 = vector.load %arg3[%c2, %c0_26] : memref<4x32xf32, #tpu.memory_space<vmem>>, vector<1x32xf32>
    %66 = vector.broadcast %64 : vector<16x1xf32> to vector<16x32xf32>
    %67 = vector.broadcast %65 : vector<1x32xf32> to vector<16x32xf32>
    %68 = arith.addf %66, %67 : vector<16x32xf32>
    %cst_27 = arith.constant 0.00999999977 : f32
    %69 = vector.broadcast %cst_27 : f32 to vector<16x32xf32>
    %70 = arith.mulf %69, %68 : vector<16x32xf32>
    %71 = arith.maximumf %68, %70 : vector<16x32xf32>
    %72 = arith.addf %71, %1 : vector<16x32xf32>
    %cst_28 = arith.constant dense<0xFF800000> : vector<16xf32>
    %73 = vector.multi_reduction <maximumf>, %72, %cst_28 [1] : vector<16x32xf32> to vector<16xf32>
    %74 = vector.shape_cast %73 : vector<16xf32> to vector<16x1xf32>
    %75 = vector.broadcast %74 : vector<16x1xf32> to vector<16x32xf32>
    %76 = arith.subf %72, %75 : vector<16x32xf32>
    %77 = math.exp %76 : vector<16x32xf32>
    %cst_29 = arith.constant dense<0.000000e+00> : vector<16xf32>
    %78 = vector.multi_reduction <add>, %77, %cst_29 [1] : vector<16x32xf32> to vector<16xf32>
    %79 = vector.shape_cast %78 : vector<16xf32> to vector<16x1xf32>
    %80 = arith.truncf %77 : vector<16x32xf32> to vector<16x32xbf16>
    %c2_30 = arith.constant 2 : index
    %c0_31 = arith.constant 0 : index
    %c0_32 = arith.constant 0 : index
    %81 = vector.load %arg4[%c2_30, %c0_31, %c0_32] : memref<4x32x32xbf16, #tpu.memory_space<vmem>>, vector<1x32x32xbf16>
    %82 = vector.shape_cast %81 : vector<1x32x32xbf16> to vector<32x32xbf16>
    %cst_33 = arith.constant dense<0.000000e+00> : vector<16x32xf32>
    %83 = tpu.matmul %80, %82, %cst_33 {dimension_numbers = #tpu.dot_dimension_numbers<[1], [0], [0], [1], [0, 0, 1, 1], [], []>} : vector<16x32xbf16>, vector<32x32xbf16>, vector<16x32xf32> -> vector<16x32xf32>
    %84 = tpu.reciprocal %79 {approx = true} : vector<16x1xf32> -> vector<16x1xf32>
    %85 = vector.broadcast %84 : vector<16x1xf32> to vector<16x32xf32>
    %86 = arith.mulf %83, %85 : vector<16x32xf32>
    %cst_34 = arith.constant 0.000000e+00 : f32
    %87 = vector.broadcast %cst_34 : f32 to vector<16x32xf32>
    %88 = arith.maximumf %86, %87 : vector<16x32xf32>
    %89 = vector.extract_strided_slice %3 {offsets = [0, 2], sizes = [16, 1], strides = [1, 1]} : vector<16x4xf32> to vector<16x1xf32>
    %90 = vector.broadcast %89 : vector<16x1xf32> to vector<16x32xf32>
    %91 = arith.mulf %90, %88 : vector<16x32xf32>
    %92 = arith.truncf %91 : vector<16x32xf32> to vector<16x32xbf16>
    %c0_35 = arith.constant 0 : index
    %c64 = arith.constant 64 : index
    %93 = vector.load %arg8[%c0_35, %c64] : memref<16x128xbf16, #tpu.memory_space<vmem>>, vector<16x32xbf16>
    tpu.vector_store %arg8[%c0_35, %c64], %92 {strides = array<i32>} : memref<16x128xbf16, #tpu.memory_space<vmem>>, vector<16x32xbf16>,
    %94 = vector.extract_strided_slice %2 {offsets = [0, 3], sizes = [16, 1], strides = [1, 1]} : vector<16x4xf32> to vector<16x1xf32>
    %c3 = arith.constant 3 : index
    %c0_36 = arith.constant 0 : index
    %95 = vector.load %arg3[%c3, %c0_36] : memref<4x32xf32, #tpu.memory_space<vmem>>, vector<1x32xf32>
    %96 = vector.broadcast %94 : vector<16x1xf32> to vector<16x32xf32>
    %97 = vector.broadcast %95 : vector<1x32xf32> to vector<16x32xf32>
    %98 = arith.addf %96, %97 : vector<16x32xf32>
    %cst_37 = arith.constant 0.00999999977 : f32
    %99 = vector.broadcast %cst_37 : f32 to vector<16x32xf32>
    %100 = arith.mulf %99, %98 : vector<16x32xf32>
    %101 = arith.maximumf %98, %100 : vector<16x32xf32>
    %102 = arith.addf %101, %1 : vector<16x32xf32>
    %cst_38 = arith.constant dense<0xFF800000> : vector<16xf32>
    %103 = vector.multi_reduction <maximumf>, %102, %cst_38 [1] : vector<16x32xf32> to vector<16xf32>
    %104 = vector.shape_cast %103 : vector<16xf32> to vector<16x1xf32>
    %105 = vector.broadcast %104 : vector<16x1xf32> to vector<16x32xf32>
    %106 = arith.subf %102, %105 : vector<16x32xf32>
    %107 = math.exp %106 : vector<16x32xf32>
    %cst_39 = arith.constant dense<0.000000e+00> : vector<16xf32>
    %108 = vector.multi_reduction <add>, %107, %cst_39 [1] : vector<16x32xf32> to vector<16xf32>
    %109 = vector.shape_cast %108 : vector<16xf32> to vector<16x1xf32>
    %110 = arith.truncf %107 : vector<16x32xf32> to vector<16x32xbf16>
    %c3_40 = arith.constant 3 : index
    %c0_41 = arith.constant 0 : index
    %c0_42 = arith.constant 0 : index
    %111 = vector.load %arg4[%c3_40, %c0_41, %c0_42] : memref<4x32x32xbf16, #tpu.memory_space<vmem>>, vector<1x32x32xbf16>
    %112 = vector.shape_cast %111 : vector<1x32x32xbf16> to vector<32x32xbf16>
    %cst_43 = arith.constant dense<0.000000e+00> : vector<16x32xf32>
    %113 = tpu.matmul %110, %112, %cst_43 {dimension_numbers = #tpu.dot_dimension_numbers<[1], [0], [0], [1], [0, 0, 1, 1], [], []>} : vector<16x32xbf16>, vector<32x32xbf16>, vector<16x32xf32> -> vector<16x32xf32>
    %114 = tpu.reciprocal %109 {approx = true} : vector<16x1xf32> -> vector<16x1xf32>
    %115 = vector.broadcast %114 : vector<16x1xf32> to vector<16x32xf32>
    %116 = arith.mulf %113, %115 : vector<16x32xf32>
    %cst_44 = arith.constant 0.000000e+00 : f32
    %117 = vector.broadcast %cst_44 : f32 to vector<16x32xf32>
    %118 = arith.maximumf %116, %117 : vector<16x32xf32>
    %119 = vector.extract_strided_slice %3 {offsets = [0, 3], sizes = [16, 1], strides = [1, 1]} : vector<16x4xf32> to vector<16x1xf32>
    %120 = vector.broadcast %119 : vector<16x1xf32> to vector<16x32xf32>
    %121 = arith.mulf %120, %118 : vector<16x32xf32>
    %122 = arith.truncf %121 : vector<16x32xf32> to vector<16x32xbf16>
    %c0_45 = arith.constant 0 : index
    %c96 = arith.constant 96 : index
    %123 = vector.load %arg8[%c0_45, %c96] : memref<16x128xbf16, #tpu.memory_space<vmem>>, vector<16x32xbf16>
    tpu.vector_store %arg8[%c0_45, %c96], %122 {strides = array<i32>} : memref<16x128xbf16, #tpu.memory_space<vmem>>, vector<16x32xbf16>,
    %c0_46 = arith.constant 0 : index
    %c0_47 = arith.constant 0 : index
    %124 = vector.load %arg8[%c0_46, %c0_47] : memref<16x128xbf16, #tpu.memory_space<vmem>>, vector<16x128xbf16>
    %c0_48 = arith.constant 0 : index
    %c0_49 = arith.constant 0 : index
    %125 = vector.load %arg6[%c0_48, %c0_49] : memref<128x32xbf16, #tpu.memory_space<vmem>>, vector<128x32xbf16>
    %cst_50 = arith.constant dense<0.000000e+00> : vector<16x32xf32>
    %126 = tpu.matmul %124, %125, %cst_50 {dimension_numbers = #tpu.dot_dimension_numbers<[1], [0], [0], [1], [0, 0, 1, 1], [], []>} : vector<16x128xbf16>, vector<128x32xbf16>, vector<16x32xf32> -> vector<16x32xf32>
    %c0_51 = arith.constant 0 : index
    %c0_52 = arith.constant 0 : index
    %127 = vector.load %arg7[%c0_51, %c0_52] : memref<16x32xf32, #tpu.memory_space<vmem>>, vector<16x32xf32>
    tpu.vector_store %arg7[%c0_51, %c0_52], %126 {strides = array<i32>} : memref<16x32xf32, #tpu.memory_space<vmem>>, vector<16x32xf32>,
    return
  }
  func.func @transform_0(%arg0: i32) -> (i32, i32) {
    %c0_i32 = arith.constant 0 : i32
    %c0_i32_0 = arith.constant 0 : i32
    return %arg0, %c0_i32 : i32, i32
  }
  func.func @transform_1(%arg0: i32) -> (i32, i32) {
    %c0_i32 = arith.constant 0 : i32
    %c0_i32_0 = arith.constant 0 : i32
    return %arg0, %c0_i32 : i32, i32
  }
  func.func @transform_2(%arg0: i32) -> (i32, i32) {
    %c0_i32 = arith.constant 0 : i32
    %c0_i32_0 = arith.constant 0 : i32
    %c0_i32_1 = arith.constant 0 : i32
    return %c0_i32, %c0_i32_0 : i32, i32
  }
  func.func @transform_3(%arg0: i32) -> (i32, i32, i32) {
    %c0_i32 = arith.constant 0 : i32
    %c0_i32_0 = arith.constant 0 : i32
    %c0_i32_1 = arith.constant 0 : i32
    %c0_i32_2 = arith.constant 0 : i32
    return %c0_i32, %c0_i32_0, %c0_i32_1 : i32, i32, i32
  }
  func.func @transform_4(%arg0: i32) -> (i32, i32) {
    %c0_i32 = arith.constant 0 : i32
    %c0_i32_0 = arith.constant 0 : i32
    return %arg0, %c0_i32 : i32, i32
  }
  func.func @transform_5(%arg0: i32) -> (i32, i32) {
    %c0_i32 = arith.constant 0 : i32
    %c0_i32_0 = arith.constant 0 : i32
    %c0_i32_1 = arith.constant 0 : i32
    return %c0_i32, %c0_i32_0 : i32, i32
  }
  func.func @transform_6(%arg0: i32) -> (i32, i32) {
    %c0_i32 = arith.constant 0 : i32
    %c0_i32_0 = arith.constant 0 : i32
    return %arg0, %c0_i32 : i32, i32
  }
}

</mosaic_0001>

<bundles_post_ra>
// kernel: tpu_custom_call.1
= control target key start
LH: loop header
LB: loop body
LE: loop exit
PB: predicated region body
PF: predicated region fallthrough
CT: control target
= control target key end

     0   :  { %11 = vsyncpa [#allocation4], 0  ;;  %s1629_s0 = inlined_call_operand.vmem [shape: bf16[32,32], index: 0, kind: input, shape index: {}]   ;;  %s1630_s1 = inlined_call_operand.vmem [shape: f32[32,4], index: 1, kind: input, shape index: {}]   ;;  %s1631_s2 = inlined_call_operand.vmem [shape: f32[4,32], index: 2, kind: input, shape index: {}]   ;;  %s1632_s3 = inlined_call_operand.vmem [shape: bf16[4,32,32], index: 3, kind: input, shape index: {}]   ;;  %s1633_s4 = inlined_call_operand.vmem [shape: f32[32,4], index: 4, kind: input, shape index: {}]   ;;  %s1634_s5 = inlined_call_operand.vmem [shape: bf16[128,32], index: 5, kind: input, shape index: {}]   ;;  %s1635_s6 = inlined_call_operand.hbm [shape: f32[32,32], index: 6, kind: output, shape index: {}]  }
   0x1   :  { %13 = vsyncpa [#allocation4 + $0x1], 0  ;;  %s1361_s21 = smov 0   ;;  %s1363_s22 = smov 0  }
   0x2   :  { %s1365_s23 = smov 0   ;;  %s1367_s24 = smov 0  }
   0x3 LB: > { %s1382_s25 = sadd.s32 4294967295, %s1312_s24   ;;  %s1009_s26 = sadd.s32 4294967294, %s1312_s24   ;;  %s1312_s24 = sphi %s1367_s24, %s1641_s24   ;;  %s1308_s23 = sphi %s1365_s23, %s1640_s23   ;;  %s1304_s22 = sphi %s1363_s22, %s1639_s22   ;;  %s1300_s21 = sphi %s1361_s21, %s1638_s21  }
   0x4   : > { %s1386_s27 = sadd.s32 1, %s1312_s24   ;;  %s167_s28 = sadd.s32 1, %s1308_s23 }
   0x5   : > { %s164_s29 = ssub.s32 %s1312_s24, %s1386_s27  ;;  %p177_p0 = scmp.ne.s32.totalorder %s1308_s23, %s1304_s22 }
   0x6   : > { %p165_p1 = scmp.eq.s32.totalorder %s164_s29, 0  ;;  %p178_p2 = scmp.eq.s32.totalorder %s1382_s25, 1 }
   0x7   : > { %p183_p3 = scmp.ne.s32.totalorder %s1304_s22, %s1300_s21  ;;  %p184_p4 = scmp.eq.s32.totalorder %s1009_s26, 1 }
   0x8   : > { %s1397_s30 = scalar_select %p165_p1, %s1308_s23, %s167_s28  }
   0x9   : > { %p1399_p5 = por %p178_p2, %p177_p0  ;;  %p1403_p6 = por %p184_p4, %p183_p3 }
   0xa   : > { %p1012_p7 = scmp.ge.s32.totalorder %s1312_s24, 1  ;;  %p238_p8 = scmp.lt.s32.totalorder %s1312_s24, 3 }
   0xc   : > { %p239_p9 = pnand %p1012_p7, %p238_p8 }
   0xd   : > { %s1014_s9 = sshll.u32 (!%p239_p9), %s1382_s25, 1  ;;  %v1314_v0 = vmov (!%p239_p9), 1   ;;  %v1315_v1 = vmov (!%p239_p9), 0   ;;  %v1316_v4 = vmov (!%p239_p9), 2   ;;  %v1317_v5 = vmov (!%p239_p9), 3   ;;  %v1202_v61 = vld [vmem:[%s1632_s3] sm:$0xff] (!%p239_p9)  }
   0xe   : > { %242 = sbr.rel (%p239_p9) target bundleno = 923 (0x39b), region = 44  ;;  %1190 = vset.pattern.permute.xlu1 (!%p239_p9), %v1314_v0  ;;  %1189 = vset.pattern.permute.xlu0 (!%p239_p9), %v1315_v1  ;;  %p279_p10 = scmp.lt.s32.totalorder (!%p239_p9), %s1014_s9, 3  ;;  %v1020_v6 = vld [vmem:[%s1631_s2] ss:$0 sm:$0xff] (!%p239_p9)  ;;  %v1024_v7 = vld [vmem:[%s1631_s2 + $0x1] ss:$0 sm:$0xff] (!%p239_p9) }
   0xf   : > { %vm329_vm0 = vcmask (!%p239_p9), 261120   ;;  %v1032_v25 = vld [vmem:[%s1631_s2 + $0x2] ss:$0 sm:$0xff] (!%p239_p9)  ;;  %v1040_v39 = vld [vmem:[%s1631_s2 + $0x3] ss:$0 sm:$0xff] (!%p239_p9)  ;;  %v1318_v63 = vmov (!%p239_p9), 0.0  }
  0x10   : > { %1087 = vmatprep.subr.bf16.mxu1 (!%p239_p9), %v1318_v63  ;;  %1119 = vmatprep.subr.bf16.mxu0 (!%p239_p9), %v1318_v63  ;;  %vm1319_vm1 = vmmov (!%p239_p9), 0   ;;  %s1322_s18 = smov (!%p239_p9), 96   ;;  %vm551_vm2 = vcmask (!%p239_p9), 523520   ;;  %vm675_vm3 = vcmask (!%p239_p9), 785920   ;;  %vm799_vm4 = vcmask (!%p239_p9), 1048320   ;;  %s275_s19 = sand.u32 (!%p239_p9), 1, %s1304_s22  }
  0x11   : > { %1088 = vmatpush3.bf16.msra.mxu1 (!%p239_p9), %v1202_v61  ;;  %1091 = vmatprep.mubr.msk.bf16.mxu1 (!%p239_p9), %vm1319_vm1, %v1318_v63  ;;  %s1013_s20 = sshll.u32 (!%p239_p9), %s275_s19, 4  ;;  %s1061_s29 = sshll.u32 (!%p239_p9), %s1382_s25, 8 }
  0x12   : > { %1089 = vmatprep.subr.bf16.mxu1 (!%p239_p9), %v1318_v63  ;;  %1135 = vmatprep.mubr.msk.bf16.mxu0 (!%p239_p9), %vm1319_vm1, %v1318_v63  ;;  %s277_s26 = scalar_lea.vmem (!%p239_p9), [#allocation3], %s1013_s20  ;;  %s1323_s16 = smov (!%p239_p9), [#allocation3]  }
  0x13   : > { %s923_s28 = sshll.u32 (!%p239_p9), %s277_s26, 4  ;;  %s1579_s28 = int_to_ptr.vmem [resolvable:$true] %s923_s28 }
  0x14   : > { %s1250_s25 = scalar_lea.vmem (!%p239_p9), %s1579_s28, 256 }
  0x15   : > { %s1643_s9 = smov (!%p279_p10, %s1014_s9), 3  ;;  %p1251_p11 = scmp.ne.s32.totalorder %s1579_s28, %s1250_s25 }
  0x16   : > { %s1017_s10 = sshll.u32 %s1643_s9, 3  ;;  %s1015_s14 = sshll.u32 %s1643_s9, 2 }
  0x17   : > { %s288_s13 = scalar_lea.vmem %s1630_s1, %s1017_s10  ;;  %s282_s17 = scalar_lea.vmem %s1629_s0, %s1015_s14 }
  0x18   : > { %v302_v2 = vld [vmem:[%s288_s13] sm:$0xff]  ;;  %v303_v3 = vld [vmem:[%s288_s13 + $0x8] sm:$0xff]  ;;  %s1455_s15 = scalar_lea.vmem %s1633_s4, %s1017_s10  ;;  %s1320_s14 = smov 32  }
  0x19   : > { %431 = vperm.xlu1 %1190, %v302_v2   ;;  %309 = vperm.xlu0 %1189, %v302_v2   ;;  %v1063_v8 = vld [vmem:[%s282_s17] sm:$0xff]   ;;  %s1321_s10 = smov 64   ;;  %s1585_s13 = scalar_lea.hbm %s1635_s6, %s1061_s29 }
  0x1a   : > { %v1064_v15 = vunpack.c.l.bf16 %v1063_v8  ;;  %v1065_v22 = vunpack.c.h.bf16 %v1063_v8  ;;  %v1461_v62 = vld [vmem:[%s1455_s15] sm:$0xff]  ;;  %p1252_p12 = pnand %p1251_p11, %p1399_p5  ;;  %s1254_s17 = sshll.u32 %s1323_s16, 4  ;;  %s1255_s17 = int_to_ptr.vmem [resolvable:$false] %s1254_s17 }
  0x1b   : > { %p1257_p0 = scmp.lt.s32.totalorder %s1579_s28, %s1255_s17 }
  0x1c   : > { %p1253_p13 = pneg %p1252_p12 }
  0x1d   : > { %435 = vperm.xlu1 %1190, %v303_v3   ;;  %314 = vperm.xlu0 %1189, %v303_v3  }
  0x21   : > { %1192 = vset.pattern.permute.xlu1 %v1316_v4  ;;  %1191 = vset.pattern.permute.xlu0 %v1316_v4 }
  0x22   : > { %559 = vperm.xlu1 %1192, %v303_v3   ;;  %555 = vperm.xlu0 %1191, %v302_v2  }
  0x26   : > { %1193 = vset.pattern.permute.xlu1 %v1317_v5  ;;  %1194 = vset.pattern.permute.xlu0 %v1317_v5 }
  0x27   : > { %679 = vperm.xlu1 %1193, %v302_v2   ;;  %683 = vperm.xlu0 %1194, %v303_v3  }
  0x2b   : > { %1195 = vset.pattern.permute.xlu1 %v1314_v0  ;;  %1196 = vset.pattern.permute.xlu0 %v1314_v0  ;;  %v1203_v0 = vld [vmem:[%s1632_s3 + $0x8] sm:$0xff]  }
  0x2c   : > { %1090 = vmatpush3.bf16.msra.mxu1 %v1203_v0 }
  0x2d   : > { %1095 = vmatprep.subr.bf16.mxu1 %v1318_v63 }
  0x98   : > { %v310_v9 = vpop.permute.xlu0 %309  ;;  %v432_v10 = vpop.permute.xlu1 %431 }
  0x99   : > { %v321_v11 = vadd.f32 %v1020_v6, %v310_v9  ;;  %v442_v12 = vadd.f32 %v1024_v7, %v432_v10 }
  0x9b   : > { %v323_v13 = vmul.f32 0.01, %v321_v11  ;;  %v444_v14 = vmul.f32 0.01, %v442_v12 }
  0x9c   : > { %v315_v16 = vpop.permute.xlu0 %314  ;;  %v436_v17 = vpop.permute.xlu1 %435 }
  0x9d   : > { %v325_v18 = vmax.f32 %v321_v11, %v323_v13  ;;  %v446_v19 = vmax.f32 %v442_v12, %v444_v14  ;;  %v322_v20 = vadd.f32 %v1020_v6, %v315_v16  ;;  %v443_v21 = vadd.f32 %v1024_v7, %v436_v17 }
  0x9f   : > { %v324_v23 = vmul.f32 0.01, %v322_v20  ;;  %v445_v24 = vmul.f32 0.01, %v443_v21  ;;  %v327_v26 = vadd.f32 %v1064_v15, %v325_v18  ;;  %v1436_v27 = vadd.f32 %v1064_v15, %v446_v19 }
  0xa1   : > { %v326_v28 = vmax.f32 %v322_v20, %v324_v23  ;;  %v447_v29 = vmax.f32 %v443_v21, %v445_v24  ;;  %v556_v30 = vpop.permute.xlu0 %555  ;;  %v560_v31 = vpop.permute.xlu1 %559  ;;  %v330_v32 = vsel %vm329_vm0, %v327_v26, -inf  ;;  %v450_v36 = vsel %vm329_vm0, %v1436_v27, -inf }
  0xa2   : > { %v566_v33 = vadd.f32 %v1032_v25, %v556_v30  ;;  %v567_v34 = vadd.f32 %v1032_v25, %v560_v31  ;;  %331 = vmax.xlane.f32.xlu1 %v330_v32 }
  0xa3   : > { %v328_v35 = vadd.f32 %v1065_v22, %v326_v28  ;;  %v449_v41 = vadd.f32 %v1065_v22, %v447_v29  ;;  %v1204_v29 = vld [vmem:[%s1632_s3 + $0x10] sm:$0xff]  }
  0xa4   : > { %v568_v37 = vmul.f32 0.01, %v566_v33  ;;  %v569_v38 = vmul.f32 0.01, %v567_v34 }
  0xa5   : > { %v333_v40 = vsel %vm329_vm0, %v328_v35, -inf  ;;  %v453_v52 = vsel %vm329_vm0, %v449_v41, -inf }
  0xa6   : > { %v570_v42 = vmax.f32 %v566_v33, %v568_v37  ;;  %v571_v43 = vmax.f32 %v567_v34, %v569_v38  ;;  %v680_v44 = vpop.permute.xlu1 %679  ;;  %334 = vmax.xlane.f32.xlu0 %v333_v40  ;;  %451 = vmax.xlane.f32.xlu1 %v450_v36  ;;  %v684_v45 = vpop.permute.xlu0 %683  ;;  %v1205_v34 = vld [vmem:[%s1632_s3 + $0x18] sm:$0xff]  }
  0xa7   : > { %v690_v46 = vadd.f32 %v1040_v39, %v680_v44  ;;  %v691_v47 = vadd.f32 %v1040_v39, %v684_v45  ;;  %v1206_v39 = vld [vmem:[%s1632_s3 + $0x20] sm:$0xff]   ;;  %v1207_v45 = vld [vmem:[%s1632_s3 + $0x28] sm:$0xff]  }
  0xa8   : > { %v572_v48 = vadd.f32 %v1064_v15, %v570_v42  ;;  %v573_v49 = vadd.f32 %v1065_v22, %v571_v43 }
  0xa9   : > { %v692_v50 = vmul.f32 0.01, %v690_v46  ;;  %v693_v51 = vmul.f32 0.01, %v691_v47 }
  0xaa   : > { %454 = vmax.xlane.f32.xlu0 %v453_v52  ;;  %v574_v53 = vsel %vm329_vm0, %v572_v48, -inf  ;;  %v577_v56 = vsel %vm329_vm0, %v573_v49, -inf }
  0xab   : > { %v694_v54 = vmax.f32 %v690_v46, %v692_v50  ;;  %v695_v55 = vmax.f32 %v691_v47, %v693_v51  ;;  %575 = vmax.xlane.f32.xlu1 %v574_v53  ;;  %v1208_v47 = vld [vmem:[%s1632_s3 + $0x30] sm:$0xff]   ;;  %v305_v51 = vld [vmem:[%s1455_s15 + $0x8] sm:$0xff]  ;;  %s1256_s15 = scalar_lea.vmem %s1255_s17, 512 }
  0xac   : > { %p1258_p1 = scmp.lt.s32.totalorder %s1256_s15, %s1250_s25 }
  0xad   : > { %v696_v57 = vadd.f32 %v1064_v15, %v694_v54  ;;  %v697_v58 = vadd.f32 %v1065_v22, %v695_v55  ;;  %v1210_v54 = vld [vmem:[%s1634_s5] sm:$0xff]  }
  0xae   : > { %578 = vmax.xlane.f32.xlu0 %v577_v56  ;;  %1120 = vmatpush3.bf16.msra.mxu0 %v1210_v54  ;;  %p1259_p2 = por %p1258_p1, %p1257_p0 }
  0xaf   : > { %v698_v59 = vsel %vm329_vm0, %v696_v57, -inf  ;;  %v701_v60 = vsel %vm329_vm0, %v697_v58, -inf  ;;  %1121 = vmatprep.subr.bf16.mxu0 %v1318_v63 }
  0xb0   : > { %699 = vmax.xlane.f32.xlu1 %v698_v59  ;;  %p1260_p3 = pnand %p1259_p2, %p1253_p13 }
  0xb2   : > { %702 = vmax.xlane.f32.xlu0 %v701_v60 }
  0xc1   : > { %537 = vperm.xlu1 %1195, %v1461_v62  }
  0xc5   : > { %1197 = vset.pattern.permute.xlu1 %v1316_v4 }
 0x12f   : > { %v332_v2 = vpop.xlane.xlu1 %331 }
 0x130   : > { %v336_v3 = vsub.f32 %v327_v26, %v332_v2 }
 0x132   : > { %v338_v6 = vmul.f32 1.442695, %v336_v3 }
 0x133   : > { %v335_v7 = vpop.xlane.xlu0 %334  ;;  %v452_v8 = vpop.xlane.xlu1 %451 }
 0x134   : > { %v337_v9 = vsub.f32 %v328_v35, %v335_v7  ;;  %v456_v10 = vsub.f32 %v1436_v27, %v452_v8  ;;  %1218 = vpow2.f32 %v338_v6 }
 0x136   : > { %v340_v11 = vmul.f32 1.442695, %v337_v9  ;;  %v458_v12 = vmul.f32 1.442695, %v456_v10 }
 0x137   : > { %v455_v13 = vpop.xlane.xlu0 %454 }
 0x138   : > { %1220 = vpow2.f32 %v340_v11  ;;  %v457_v14 = vsub.f32 %v449_v41, %v455_v13  ;;  %v576_v15 = vpop.xlane.xlu1 %575 }
 0x139   : > { %1222 = vpow2.f32 %v458_v12  ;;  %v580_v4 = vsub.f32 %v572_v48, %v576_v15  ;;  %v1212_v12 = vld [vmem:[%s1634_s5 + $0x10] sm:$0xff]   ;;  %v1213_v15 = vld [vmem:[%s1634_s5 + $0x18] sm:$0xff]  }
 0x13a   : > { %v460_v16 = vmul.f32 1.442695, %v457_v14 }
 0x13b   : > { %v582_v17 = vmul.f32 1.442695, %v580_v4  ;;  %v579_v18 = vpop.xlane.xlu0 %578 }
 0x13c   : > { %1224 = vpow2.f32 %v460_v16  ;;  %v581_v19 = vsub.f32 %v573_v49, %v579_v18  ;;  %v1209_v49 = vld [vmem:[%s1632_s3 + $0x38] sm:$0xff]  }
 0x13d   : > { %1226 = vpow2.f32 %v582_v17  ;;  %v700_v20 = vpop.xlane.xlu1 %699 }
 0x13e   : > { %v584_v21 = vmul.f32 1.442695, %v581_v19  ;;  %v704_v22 = vsub.f32 %v696_v57, %v700_v20  ;;  %v1477_v26 = vpop.eup %1218 }
 0x13f   : > { %v703_v23 = vpop.xlane.xlu0 %702  ;;  %v342_v53 = vsel %vm329_vm0, %v1477_v26, 0.0 }
 0x140   : > { %1228 = vpow2.f32 %v584_v21  ;;  %v706_v24 = vmul.f32 1.442695, %v704_v22  ;;  %v705_v25 = vsub.f32 %v697_v58, %v703_v23 }
 0x141   : > { %v538_v55 = vpop.permute.xlu1 %537 }
 0x142   : > { %v1221_v27 = vpop.eup %1220  ;;  %1230 = vpow2.f32 %v706_v24  ;;  %v708_v28 = vmul.f32 1.442695, %v705_v25  ;;  %v1214_v24 = vld [vmem:[%s1634_s5 + $0x20] sm:$0xff]  }
 0x143   : > { %v1223_v30 = vpop.eup %1222  ;;  %v348_v31 = vpack.c.bf16 %v1221_v27, %v1477_v26  ;;  %v345_v52 = vsel %vm329_vm0, %v1221_v27, 0.0 }
 0x144   : > { %1232 = vpow2.f32 %v708_v28  ;;  %v462_v32 = vsel %vm329_vm0, %v1223_v30, 0.0 }
 0x145   : > { %463 = vadd.xlane.f32.xlu1 %v462_v32  ;;  %1092 = vmatmul.mubr.msk.bf16.vlgmr.msra.gmra.mrb[0].mxu1 %vm329_vm0, %v348_v31 }
 0x146   : > { %v1225_v33 = vpop.eup %1224  ;;  %1096 = vmatpush3.bf16.msra.mxu1 %v1204_v29  ;;  %1099 = vmatprep.mubr.msk.bf16.mxu1 %vm1319_vm1, %v1318_v63 }
 0x147   : > { %v1227_v35 = vpop.eup %1226  ;;  %v465_v36 = vsel %vm329_vm0, %v1225_v33, 0.0  ;;  %1097 = vmatprep.subr.bf16.mxu1 %v1318_v63  ;;  %v468_v41 = vpack.c.bf16 %v1225_v33, %v1223_v30  ;;  %v1215_v30 = vld [vmem:[%s1634_s5 + $0x28] sm:$0xff]  }
 0x148   : > { %466 = vadd.xlane.f32.xlu0 %v465_v36  ;;  %v586_v37 = vsel %vm329_vm0, %v1227_v35, 0.0 }
 0x149   : > { %587 = vadd.xlane.f32.xlu1 %v586_v37 }
 0x14a   : > { %v1229_v38 = vpop.eup %1228  ;;  %1098 = vmatpush3.bf16.msra.mxu1 %v1205_v34 }
 0x14b   : > { %v589_v40 = vsel %vm329_vm0, %v1229_v38, 0.0  ;;  %1103 = vmatprep.subr.bf16.mxu1 %v1318_v63  ;;  %v592_v48 = vpack.c.bf16 %v1229_v38, %v1227_v35 }
 0x14c   : > { %v1231_v42 = vpop.eup %1230  ;;  %590 = vadd.xlane.f32.xlu0 %v589_v40 }
 0x14d   : > { %1100 = vmatmul.mubr.msk.bf16.vlgmr.msra.gmra.mrb[4].mxu1 %vm329_vm0, %v468_v41  ;;  %v710_v43 = vsel %vm329_vm0, %v1231_v42, 0.0 }
 0x14e   : > { %v1233_v44 = vpop.eup %1232  ;;  %1104 = vmatpush3.bf16.msra.mxu1 %v1206_v39  ;;  %711 = vadd.xlane.f32.xlu1 %v710_v43 }
 0x14f   : > { %v713_v46 = vsel %vm329_vm0, %v1233_v44, 0.0  ;;  %1105 = vmatprep.subr.bf16.mxu1 %v1318_v63  ;;  %1107 = vmatprep.mubr.msk.bf16.mxu1 %vm1319_vm1, %v1318_v63  ;;  %v716_v50 = vpack.c.bf16 %v1233_v44, %v1231_v42  ;;  %v1216_v44 = vld [vmem:[%s1634_s5 + $0x30] sm:$0xff]  }
 0x150   : > { %714 = vadd.xlane.f32.xlu0 %v713_v46 }
 0x152   : > { %1106 = vmatpush3.bf16.msra.mxu1 %v1207_v45 }
 0x153   : > { %1111 = vmatprep.subr.bf16.mxu1 %v1318_v63 }
 0x155   : > { %1108 = vmatmul.mubr.msk.bf16.vlgmr.msra.gmra.mrb[8].mxu1 %vm329_vm0, %v592_v48 }
 0x156   : > { %1112 = vmatpush3.bf16.msra.mxu1 %v1208_v47  ;;  %1115 = vmatprep.mubr.msk.bf16.mxu1 %vm1319_vm1, %v1318_v63 }
 0x157   : > { %1113 = vmatprep.subr.bf16.mxu1 %v1318_v63 }
 0x15a   : > { %1114 = vmatpush3.bf16.msra.mxu1 %v1209_v49 }
 0x15d   : > { %1116 = vmatmul.mubr.msk.bf16.vlgmr.msra.gmra.mrb[12].mxu1 %vm329_vm0, %v716_v50 }
 0x15f   : > { %661 = vperm.xlu1 %1197, %v1461_v62  }
 0x163   : > { %665 = vperm.xlu1 %1197, %v305_v51  }
 0x166   : > { %541 = vperm.xlu0 %1196, %v305_v51  }
 0x167   : > { %1198 = vset.pattern.permute.xlu1 %v1317_v5 }
 0x168   : > { %785 = vperm.xlu1 %1198, %v1461_v62  }
 0x16a   : > { %1200 = vset.pattern.permute.xlu0 %v1315_v1 }
 0x16c   : > { %789 = vperm.xlu1 %1198, %v305_v51  }
 0x170   : > { %1199 = vset.pattern.permute.xlu1 %v1315_v1  ;;  %v1211_v1 = vld [vmem:[%s1634_s5 + $0x8] sm:$0xff]  }
 0x171   : > { %417 = vperm.xlu1 %1199, %v1461_v62   ;;  %1122 = vmatpush3.bf16.msra.mxu0 %v1211_v1 }
 0x172   : > { %1123 = vmatprep.subr.bf16.mxu0 %v1318_v63 }
 0x175   : > { %1124 = vmatpush3.bf16.msra.mxu0 %v1212_v12 }
 0x176   : > { %1125 = vmatprep.subr.bf16.mxu0 %v1318_v63 }
 0x179   : > { %1126 = vmatpush3.bf16.msra.mxu0 %v1213_v15 }
 0x17a   : > { %1127 = vmatprep.subr.bf16.mxu0 %v1318_v63 }
 0x17d   : > { %1128 = vmatpush3.bf16.msra.mxu0 %v1214_v24 }
 0x17e   : > { %1129 = vmatprep.subr.bf16.mxu0 %v1318_v63 }
 0x181   : > { %1130 = vmatpush3.bf16.msra.mxu0 %v1215_v30 }
 0x182   : > { %1131 = vmatprep.subr.bf16.mxu0 %v1318_v63 }
 0x185   : > { %346 = vadd.xlane.f32.xlu0 %v345_v52  ;;  %1132 = vmatpush3.bf16.msra.mxu0 %v1216_v44 }
 0x186   : > { %1133 = vmatprep.subr.bf16.mxu0 %v1318_v63 }
 0x195   : > { %343 = vadd.xlane.f32.xlu1 %v342_v53 }
 0x19b   : > { %422 = vperm.xlu0 %1200, %v305_v51   ;;  %v1217_v51 = vld [vmem:[%s1634_s5 + $0x38] sm:$0xff]  }
 0x19c   : > { %1134 = vmatpush3.bf16.msra.mxu0 %v1217_v51 }
 0x19f   : > { %1201 = vset.pattern.permute.xlu0 %v1317_v5 }
 0x1d2   : > { %v464_v56 = vpop.xlane.xlu1 %463 }
 0x1d3   : > { %1234 = vrcp.f32 %v464_v56 }
 0x1d5   : > { %v467_v59 = vpop.xlane.xlu0 %466 }
 0x1d6   : > { %v588_v57 = vpop.xlane.xlu1 %587  ;;  %1236 = vrcp.f32 %v467_v59 }
 0x1d9   : > { %v591_v60 = vpop.xlane.xlu0 %590 }
 0x1db   : > { %v712_v58 = vpop.xlane.xlu1 %711 }
 0x1dd   : > { %v715_v62 = vpop.xlane.xlu0 %714  ;;  %v1235_v13 = vpop.eup %1234 }
 0x1df   : > { %v1538_v5 = vpop.permute.xlu1 %661 }
 0x1e0   : > { %v1237_v17 = vpop.eup %1236 }
 0x1e3   : > { %v1540_v61 = vpop.permute.xlu1 %665 }
 0x1e5   : > { %v542_v2 = vpop.permute.xlu0 %541 }
 0x1e7   : > { %v1542_v0 = vpop.permute.xlu1 %785 }
 0x1eb   : > { %v1544_v3 = vpop.permute.xlu1 %789 }
 0x1f0   : > { %v1546_v11 = vpop.permute.xlu1 %417 }
 0x212   : > { %v347_v8 = vpop.xlane.xlu0 %346 }
 0x213   : > { %1238 = vrcp.f32 %v347_v8 }
 0x214   : > { %1240 = vrcp.f32 %v588_v57 }
 0x215   : > { %1242 = vrcp.f32 %v591_v60 }
 0x218   : > { %v402_v6 = vpop.f32.mrb[0].mxu1 }
 0x219   : > { %v1093_v7 = vpop.f32.mrb[1].mxu1 }
 0x21a   : > { %v405_v9 = vpop.f32.mrb[2].mxu1  ;;  %v423_v45 = vpop.permute.xlu0 %422 }
 0x21b   : > { %v1094_v10 = vpop.f32.mrb[3].mxu1 }
 0x21d   : > { %v1239_v25 = vpop.eup %1238 }
 0x21e   : > { %v1241_v28 = vpop.eup %1240  ;;  %v412_v35 = vmul.f32 %v1239_v25, %v405_v9 }
 0x21f   : > { %v1243_v34 = vpop.eup %1242 }
 0x220   : > { %v523_v14 = vpop.f32.mrb[4].mxu1  ;;  %v414_v42 = vmax.f32 %v412_v35, 0.0 }
 0x221   : > { %v532_v4 = vmul.f32 %v1235_v13, %v523_v14  ;;  %v1101_v16 = vpop.f32.mrb[5].mxu1 }
 0x222   : > { %v526_v18 = vpop.f32.mrb[6].mxu1  ;;  %v344_v19 = vpop.xlane.xlu1 %343 }
 0x223   : > { %v534_v20 = vmax.f32 %v532_v4, 0.0  ;;  %v533_v21 = vmul.f32 %v1237_v17, %v526_v18  ;;  %1244 = vrcp.f32 %v344_v19  ;;  %v1102_v22 = vpop.f32.mrb[7].mxu1 }
 0x224   : > { %1246 = vrcp.f32 %v712_v58 }
 0x225   : > { %v535_v23 = vmax.f32 %v533_v21, 0.0  ;;  %v544_v26 = vmul.f32 %v538_v55, %v534_v20  ;;  %1248 = vrcp.f32 %v715_v62  ;;  %v426_v55 = vmul.f32 %v423_v45, %v414_v42 }
 0x227   : > { %v545_v27 = vmul.f32 %v542_v2, %v535_v23 }
 0x228   : > { %v647_v29 = vpop.f32.mrb[8].mxu1 }
 0x229   : > { %v656_v31 = vmul.f32 %v1241_v28, %v647_v29  ;;  %v1109_v32 = vpop.f32.mrb[9].mxu1  ;;  %v546_v33 = vpack.c.bf16 %v545_v27, %v544_v26 }
 0x22a   : > { %v650_v36 = vpop.f32.mrb[10].mxu1 }
 0x22b   : > { %v658_v37 = vmax.f32 %v656_v31, 0.0  ;;  %v657_v38 = vmul.f32 %v1243_v34, %v650_v36  ;;  %v1110_v39 = vpop.f32.mrb[11].mxu1  ;;  %548 = vrot.lane.b32.xlu1 %v546_v33, %s1320_s14  ;;  %s1588_s14 = scalar_lea.sflag [#allocation4], %s275_s19 }
 0x22d   : > { %v1245_v40 = vpop.eup %1244  ;;  %v659_v41 = vmax.f32 %v657_v38, 0.0  ;;  %v668_v46 = vmul.f32 %v1538_v5, %v658_v37 }
 0x22e   : > { %v411_v43 = vmul.f32 %v1245_v40, %v402_v6  ;;  %v1247_v48 = vpop.eup %1246 }
 0x22f   : > { %v669_v47 = vmul.f32 %v1540_v61, %v659_v41  ;;  %v1249_v1 = vpop.eup %1248 }
 0x230   : > { %v771_v49 = vpop.f32.mrb[12].mxu1  ;;  %v413_v50 = vmax.f32 %v411_v43, 0.0 }
 0x231   : > { %v780_v52 = vmul.f32 %v1247_v48, %v771_v49  ;;  %v1117_v53 = vpop.f32.mrb[13].mxu1  ;;  %v670_v54 = vpack.c.bf16 %v669_v47, %v668_v46 }
 0x232   : > { %v774_v56 = vpop.f32.mrb[14].mxu1  ;;  %v425_v57 = vmul.f32 %v1546_v11, %v413_v50 }
 0x233   : > { %v782_v58 = vmax.f32 %v780_v52, 0.0  ;;  %v781_v59 = vmul.f32 %v1249_v1, %v774_v56  ;;  %v1118_v5 = vpop.f32.mrb[15].mxu1  ;;  %672 = vrot.lane.b32.xlu1 %v670_v54, %s1321_s10 }
 0x234   : > { %v427_v60 = vpack.c.bf16 %v426_v55, %v425_v57 }
 0x235   : > { %v783_v61 = vmax.f32 %v781_v59, 0.0  ;;  %v792_v62 = vmul.f32 %v1542_v0, %v782_v58 }
 0x236   : > { %428 = vst.msk [vmem:[#allocation2] sm:$0xff] %vm329_vm0, %v427_v60 }
 0x237   : > { %v793_v63 = vmul.f32 %v1544_v3, %v783_v61 }
 0x239   : > { %v794_v2 = vpack.c.bf16 %v793_v63, %v792_v62 }
 0x23b   : > { %796 = vrot.lane.b32.xlu1 %v794_v2, %s1322_s18 }
 0x29d   : > { %v549_v6 = vpop.permute.xlu1 %548 }
 0x29e   : > { %552 = vst.msk [vmem:[#allocation2] sm:$0xff] %vm551_vm2, %v549_v6 }
 0x2a5   : > { %v673_v7 = vpop.permute.xlu1 %672 }
 0x2a6   : > { %676 = vst.msk [vmem:[#allocation2] sm:$0xff] %vm675_vm3, %v673_v7 }
 0x2ad   : > { %v797_v8 = vpop.permute.xlu1 %796 }
 0x2ae   : > { %800 = vst.msk [vmem:[#allocation2] sm:$0xff] %vm799_vm4, %v797_v8 }
 0x2b5   : > { %v801_v9 = vld [vmem:[#allocation2] sm:$0xff] }
 0x2b6   : > { %1136 = vmatmul.mubr.bf16.vlgmr.msra.gmra.mrb[0].mxu0 %v801_v9 }
 0x389   : > { %v900_v0 = vpop.f32.mrb[0].mxu0 }
 0x38a   : > { %907 = vst.msk [vmem:[%s277_s26] sm:$0xff] %vm329_vm0, %v900_v0  ;;  %v1137_v3 = vpop.f32.mrb[1].mxu0 }
 0x38b   : > { %v903_v10 = vpop.f32.mrb[2].mxu0 }
 0x38c   : > { %908 = vst.msk [vmem:[%s277_s26 + $0x8] sm:$0xff] %vm329_vm0, %v903_v10  ;;  %v1138_v11 = vpop.f32.mrb[3].mxu0 }
 0x38d   : > { %1263 = shalt.err (!%p1260_p3)
}
 0x38e   : > { %s1264_s9 = scalar_lea.hbm %s1585_s13, 256  ;;  %s1268_s19 = scalar_lea.hbm %s1635_s6, 512 }
 0x38f   : > { %p1265_p4 = scmp.ne.s32.totalorder %s1585_s13, %s1264_s9  ;;  %p1269_p9 = scmp.lt.u32.totalorder %s1585_s13, %s1635_s6 }
 0x390   : > { %p1270_p10 = scmp.lt.u32.totalorder %s1268_s19, %s1264_s9  ;;  %p1272_p12 = scmp.lt.u32.totalorder %s1264_s9, %s1585_s13 }
 0x391   : > { %p1266_p7 = pnand %p1265_p4, %p1399_p5 }
 0x392   : > { %p1271_p11 = por %p1270_p10, %p1269_p9 }
 0x393   : > { %p1267_p8 = pneg %p1266_p7 }
 0x394   : > { %p1273_p13 = por %p1272_p12, %p1271_p11 }
 0x396   : > { %p1274_p0 = pnand %p1273_p13, %p1267_p8 }
 0x398   : > { %1277 = shalt.err (!%p1274_p0)
}
 0x399   : > { %s1324_s29 = smov 128   ;;  %s1325_s11 = smov 8  }
 0x39a   : > { %1139 = dma.vmem_to_hbm [thread:$0]  (%p1399_p5), %s1579_s28, 256, %s1585_s13, %s1588_s14, %s1324_s29, %s1324_s29, %s1325_s11  }
 0x39b PF: > { %p1145_p1 = scmp.ge.s32.totalorder %s1312_s24, 2  ;;  %s938_s12 = sand.u32 1, %s1300_s21  }
 0x39c   : > { %s939_s25 = scalar_lea.sflag [#allocation4], %s938_s12 }
 0x39d   : > { %p1142_p2 = pnand %p1145_p1, %p1403_p6 }
 0x39f   : > { %1295 = dma.done.wait (!%p1142_p2), %s939_s25, 256  }
 0x3a0   : > { %1297 = vsyncadd (!%p1142_p2), %s939_s25, 4294967040  ;;  %p16_p3 = scmp.ge.s32.totalorder %s1386_s27, 4   ;;  %s1638_s21 = smov %s1304_s22 }
 0x3a1   : > { %s1639_s22 = smov %s1308_s23  ;;  %s1640_s23 = smov %s1397_s30 }
 0x3a2   : > { %s1641_s24 = smov %s1386_s27  ;;  %18 = sbr.rel (!%p16_p3) target bundleno = 3 (0x3), region = 88 }
 0x3a9   :  { %944 = vsyncpa [#allocation4], 1 }
 0x3aa   :  { %946 = vsyncpa [#allocation4 + $0x1], 1 }

</bundles_post_ra>
